<compile_context>
chip_gen: v7x
topology: tpu7x:2x2x1
jax: 0.10.0
libtpu: 0.0.40
codegen_flags: <defaults>
</compile_context>

<pallas_src>
import functools

import jax
import jax.numpy as jnp
from jax import lax
from jax.experimental import pallas as pl
from jax.experimental.pallas import tpu as pltpu  # noqa: F401  (kept for TPU-specific tuning hooks)


# ---------------------------------------------------------------------------
# Kernel
# ---------------------------------------------------------------------------
def _edge_weight_norm_kernel(src_ref, dst_ref, w_ref, out_ref, *, num_nodes, eps, norm):
    src = src_ref[...]                 # (1, E) int32 ; padded edges carry id == num_nodes (no match)
    dst = dst_ref[...]                 # (1, E) int32
    w = w_ref[...]                     # (1, E) f32   ; padded edges carry weight 0
    e_pad = w.shape[1]
    n_pad = ((num_nodes + 7) // 8) * 8                                   # sublane-align incidence

    if norm == "none":
        out_ref[...] = w
        return

    # Node-vs-edge one-hot incidence, built on the VPU from an iota compare.
    node_ids = lax.broadcasted_iota(jnp.int32, (n_pad, e_pad), 0)        # (N, E)
    onehot_src = (node_ids == src).astype(jnp.float32)                   # (N, E)
    onehot_dst = (node_ids == dst).astype(jnp.float32)                   # (N, E)

    # Scatter-add (weighted degrees) as MXU matmuls contracting the edge axis:
    #   (1, E) . (N, E)^T -> (1, N)
    contract_edges = (((1,), (1,)), ((), ()))
    out_deg = lax.dot_general(w, onehot_src, contract_edges,
                              preferred_element_type=jnp.float32)        # (1, N)
    in_deg = lax.dot_general(w, onehot_dst, contract_edges,
                             preferred_element_type=jnp.float32)         # (1, N)

    # Per-node normalizers (zero-degree / padded nodes masked to 0 — never gathered).
    if norm == "both":
        src_norm = jnp.where(out_deg > 0.0, lax.rsqrt(out_deg + eps), 0.0)
        dst_norm = jnp.where(in_deg > 0.0, lax.rsqrt(in_deg + eps), 0.0)
    else:  # 'right'-style: src side stays 1, dst side is 1/deg
        src_norm = jnp.ones_like(out_deg)
        dst_norm = jnp.where(in_deg > 0.0, 1.0 / (in_deg + eps), 0.0)

    # Gather the per-node normalizer back onto every edge as plain MXU matmuls:
    #   (1, N) @ (N, E) -> (1, E)   (lane-dense output row)
    edge_src_norm = jnp.dot(src_norm, onehot_src, preferred_element_type=jnp.float32)
    edge_dst_norm = jnp.dot(dst_norm, onehot_dst, preferred_element_type=jnp.float32)

    out_ref[...] = edge_src_norm * edge_dst_norm * w


# ---------------------------------------------------------------------------
# Wrapper (single pallas_call; whole problem as one lane-dense block)
# ---------------------------------------------------------------------------
def edge_weight_norm(src_ids, dst_ids, edge_weight, num_nodes, *, norm="both", eps=0.0):
    """EdgeWeightNorm forward. src_ids/dst_ids/edge_weight are 1-D arrays of length E."""
    e = edge_weight.shape[0]
    e_pad = max(128, pl.cdiv(e, 128) * 128)                              # lane-dense edge axis
    pad = e_pad - e
    # Padded edges: out-of-range node id (never matches any node) and weight 0.
    src_p = jnp.pad(src_ids.astype(jnp.int32), (0, pad), constant_values=num_nodes)[None, :]
    dst_p = jnp.pad(dst_ids.astype(jnp.int32), (0, pad), constant_values=num_nodes)[None, :]
    w_p = jnp.pad(edge_weight.astype(jnp.float32), (0, pad))[None, :]

    full = lambda shape: pl.BlockSpec(shape, lambda: (0,) * len(shape))
    out = pl.pallas_call(
        functools.partial(_edge_weight_norm_kernel,
                          num_nodes=int(num_nodes), eps=float(eps), norm=norm),
        out_shape=jax.ShapeDtypeStruct((1, e_pad), jnp.float32),
        in_specs=[full((1, e_pad)), full((1, e_pad)), full((1, e_pad))],
        out_specs=full((1, e_pad)),
    )(src_p, dst_p, w_p)
    return out[0, :e]


# ---------------------------------------------------------------------------
# Pure-JAX reference (silent correctness check)
# ---------------------------------------------------------------------------
def edge_weight_norm_ref(src_ids, dst_ids, edge_weight, num_nodes, *, norm="both", eps=0.0):
    w = edge_weight.astype(jnp.float32)
    if norm == "none":
        return w
    out_deg = jnp.zeros((num_nodes,), jnp.float32).at[src_ids].add(w)
    in_deg = jnp.zeros((num_nodes,), jnp.float32).at[dst_ids].add(w)
    if norm == "both":
        src_norm = (out_deg + eps) ** -0.5
        dst_norm = (in_deg + eps) ** -0.5
    else:
        src_norm = jnp.ones((num_nodes,), jnp.float32)
        dst_norm = 1.0 / (in_deg + eps)
    return src_norm[src_ids] * dst_norm[dst_ids] * w


# ---------------------------------------------------------------------------
# Main
# ---------------------------------------------------------------------------
if __name__ == "__main__":
    NUM_NODES = 32
    NUM_EDGES = 200          # padded to 256 (lane-dense) inside the wrapper

    key = jax.random.PRNGKey(0)
    k_src, k_dst, k_w = jax.random.split(key, 3)
    src_ids = jax.random.randint(k_src, (NUM_EDGES,), 0, NUM_NODES, dtype=jnp.int32)
    dst_ids = jax.random.randint(k_dst, (NUM_EDGES,), 0, NUM_NODES, dtype=jnp.int32)
    # norm='both' requires strictly positive edge weights (as enforced by the DGL module).
    edge_weight = jax.random.uniform(k_w, (NUM_EDGES,), minval=0.1, maxval=2.0,
                                     dtype=jnp.float32)

    out = jax.block_until_ready(
        edge_weight_norm(src_ids, dst_ids, edge_weight, NUM_NODES, norm="both", eps=0.0))
    ref = jax.block_until_ready(
        edge_weight_norm_ref(src_ids, dst_ids, edge_weight, NUM_NODES, norm="both", eps=0.0))

    assert out.shape == (NUM_EDGES,)
    assert jnp.allclose(out, ref, atol=1e-5, rtol=1e-4), float(jnp.max(jnp.abs(out - ref)))
    print("KERNEL_OK")
</pallas_src>

<mosaic_0001>
module attributes {stable_mosaic.version = 11 : i64} {
  func.func @_edge_weight_norm_kernel(%arg0: memref<1x256xi32, #tpu.memory_space<vmem>>, %arg1: memref<1x256xi32, #tpu.memory_space<vmem>>, %arg2: memref<1x256xf32, #tpu.memory_space<vmem>>, %arg3: memref<1x256xf32, #tpu.memory_space<vmem>>) attributes {dimension_semantics = [], scalar_prefetch = 0 : i64, scratch_operands = 0 : i64, tpu.core_type = #tpu.core_type<tc>} {
    %c0 = arith.constant 0 : index
    %c0_0 = arith.constant 0 : index
    %0 = vector.load %arg0[%c0, %c0_0] : memref<1x256xi32, #tpu.memory_space<vmem>>, vector<1x256xi32>
    %c0_1 = arith.constant 0 : index
    %c0_2 = arith.constant 0 : index
    %1 = vector.load %arg1[%c0_1, %c0_2] : memref<1x256xi32, #tpu.memory_space<vmem>>, vector<1x256xi32>
    %c0_3 = arith.constant 0 : index
    %c0_4 = arith.constant 0 : index
    %2 = vector.load %arg2[%c0_3, %c0_4] : memref<1x256xf32, #tpu.memory_space<vmem>>, vector<1x256xf32>
    %3 = tpu.iota {dimensions = array<i32: 0>} : vector<32x256xi32>
    %4 = vector.broadcast %0 : vector<1x256xi32> to vector<32x256xi32>
    %5 = arith.cmpi eq, %3, %4 : vector<32x256xi32>
    %6 = arith.extui %5 : vector<32x256xi1> to vector<32x256xi32>
    %7 = arith.sitofp %6 : vector<32x256xi32> to vector<32x256xf32>
    %8 = vector.broadcast %1 : vector<1x256xi32> to vector<32x256xi32>
    %9 = arith.cmpi eq, %3, %8 : vector<32x256xi32>
    %10 = arith.extui %9 : vector<32x256xi1> to vector<32x256xi32>
    %11 = arith.sitofp %10 : vector<32x256xi32> to vector<32x256xf32>
    %cst = arith.constant dense<0.000000e+00> : vector<1x32xf32>
    %12 = tpu.matmul %2, %7, %cst {dimension_numbers = #tpu.dot_dimension_numbers<[1], [1], [0], [0], [0, 0, 1, 0], [], []>} : vector<1x256xf32>, vector<32x256xf32>, vector<1x32xf32> -> vector<1x32xf32>
    %cst_5 = arith.constant dense<0.000000e+00> : vector<1x32xf32>
    %13 = tpu.matmul %2, %11, %cst_5 {dimension_numbers = #tpu.dot_dimension_numbers<[1], [1], [0], [0], [0, 0, 1, 0], [], []>} : vector<1x256xf32>, vector<32x256xf32>, vector<1x32xf32> -> vector<1x32xf32>
    %cst_6 = arith.constant 0.000000e+00 : f32
    %14 = vector.broadcast %cst_6 : f32 to vector<1x32xf32>
    %15 = arith.cmpf ogt, %12, %14 : vector<1x32xf32>
    %cst_7 = arith.constant 0.000000e+00 : f32
    %16 = vector.broadcast %cst_7 : f32 to vector<1x32xf32>
    %17 = arith.addf %12, %16 : vector<1x32xf32>
    %18 = math.rsqrt %17 : vector<1x32xf32>
    %cst_8 = arith.constant 0.000000e+00 : f32
    %19 = vector.broadcast %cst_8 : f32 to vector<1x32xf32>
    %20 = arith.select %15, %18, %19 : vector<1x32xi1>, vector<1x32xf32>
    %cst_9 = arith.constant 0.000000e+00 : f32
    %21 = vector.broadcast %cst_9 : f32 to vector<1x32xf32>
    %22 = arith.cmpf ogt, %13, %21 : vector<1x32xf32>
    %cst_10 = arith.constant 0.000000e+00 : f32
    %23 = vector.broadcast %cst_10 : f32 to vector<1x32xf32>
    %24 = arith.addf %13, %23 : vector<1x32xf32>
    %25 = math.rsqrt %24 : vector<1x32xf32>
    %cst_11 = arith.constant 0.000000e+00 : f32
    %26 = vector.broadcast %cst_11 : f32 to vector<1x32xf32>
    %27 = arith.select %22, %25, %26 : vector<1x32xi1>, vector<1x32xf32>
    %cst_12 = arith.constant dense<0.000000e+00> : vector<1x256xf32>
    %28 = tpu.matmul %20, %7, %cst_12 {dimension_numbers = #tpu.dot_dimension_numbers<[1], [0], [0], [1], [0, 0, 1, 1], [], []>} : vector<1x32xf32>, vector<32x256xf32>, vector<1x256xf32> -> vector<1x256xf32>
    %cst_13 = arith.constant dense<0.000000e+00> : vector<1x256xf32>
    %29 = tpu.matmul %27, %11, %cst_13 {dimension_numbers = #tpu.dot_dimension_numbers<[1], [0], [0], [1], [0, 0, 1, 1], [], []>} : vector<1x32xf32>, vector<32x256xf32>, vector<1x256xf32> -> vector<1x256xf32>
    %30 = arith.mulf %28, %29 : vector<1x256xf32>
    %31 = arith.mulf %30, %2 : vector<1x256xf32>
    %c0_14 = arith.constant 0 : index
    %c0_15 = arith.constant 0 : index
    %32 = vector.load %arg3[%c0_14, %c0_15] : memref<1x256xf32, #tpu.memory_space<vmem>>, vector<1x256xf32>
    tpu.vector_store %arg3[%c0_14, %c0_15], %31 {strides = array<i32>} : memref<1x256xf32, #tpu.memory_space<vmem>>, vector<1x256xf32>,
    return
  }
}

</mosaic_0001>

<bundles_post_ra>
// kernel: tpu_custom_call.1
= control target key start
LH: loop header
LB: loop body
LE: loop exit
PB: predicated region body
PF: predicated region fallthrough
CT: control target
= control target key end

     0   :  { %8 = vsyncpa [#allocation3], 0  ;;  %s710_s0 = inlined_call_operand.hbm [shape: s32[1,256], index: 0, kind: input, shape index: {}]   ;;  %s711_s1 = inlined_call_operand.vmem [shape: s32[1,256], index: 1, kind: input, shape index: {}]   ;;  %s712_s2 = inlined_call_operand.vmem [shape: f32[1,256], index: 2, kind: input, shape index: {}]   ;;  %s713_s3 = inlined_call_operand.hbm [shape: f32[1,256], index: 3, kind: output, shape index: {}]  }
   0x1   :  { %9 = vsyncpa [#allocation4], 0  ;;  %s588_s12 = smov [#allocation2]   ;;  %s540_s16 = scalar_lea.hbm %s710_s0, 32 }
   0x2   :  { %s16_s13 = sshll.u32 %s588_s12, 4  ;;  %p541_p0 = scmp.ne.s32.totalorder %s710_s0, %s540_s16  ;;  %s17_s13 = int_to_ptr.vmem [resolvable:$true] %s16_s13 }
   0x3   :  { %p544_p1 = scmp.lt.u32.totalorder %s540_s16, %s710_s0 }
   0x5   :  { %p546_p2 = pnand %p544_p1, %p541_p0 }
   0x7   :  { %549 = shalt.err (!%p546_p2)
}
   0x8   :  { %s550_s21 = scalar_lea.vmem %s17_s13, 32  ;;  %p555_p4 = scmp.lt.s32.totalorder %s17_s13, %s17_s13 }
   0x9   :  { %p551_p3 = scmp.ne.s32.totalorder %s17_s13, %s550_s21  ;;  %p556_p5 = scmp.lt.s32.totalorder %s550_s21, %s550_s21 }
   0xb   :  { %p557_p6 = por %p556_p5, %p555_p4 }
   0xd   :  { %p558_p7 = pnand %p557_p6, %p551_p3 }
   0xf   :  { %561 = shalt.err (!%p558_p7)
}
  0x10   :  { %19 = dma.hbm_to_vmem [thread:$0]  %s710_s0, 32, %s17_s13, [#allocation3]  }
  0x11   :  { %584 = dma.done.wait [#allocation3], 32  }
  0x12   :  { %585 = vsyncadd [#allocation3], 4294967264  ;;  %v30_v0 = vlaneseq  ;;  %v27_v7 = vld [vmem:[#allocation2] sm:$0x3]  ;;  %v589_v16 = vmov 1.0|1.0  }
  0x13   :  { %v28_v8 = vld [vmem:[%s711_s1] sm:$0x3]  ;;  %v590_v23 = vmov 0.0   ;;  %v591_v32 = vmov 1966171168   ;;  %s592_s1 = smov [#allocation5]  }
  0x14   :  { %v626_v1 = vshrl.u32 %v30_v0, 7  ;;  %v29_v9 = vld [vmem:[%s712_s2] sm:$0x3]  ;;  %v415_v33 = vunpack.c.l.s4 %v591_v32  ;;  %s440_s2 = sshll.u32 %s592_s1, 4  ;;  %s441_s2 = int_to_ptr.vmem [resolvable:$true] %s440_s2 }
  0x15   :  { %s562_s27 = scalar_lea.vmem %s441_s2, 32  ;;  %p567_p9 = scmp.lt.s32.totalorder %s441_s2, %s441_s2 }
  0x16   :  { %v41_v2 = vsub.s32 1, %v626_v1  ;;  %v37_v3 = vsub.s32 0, %v626_v1  ;;  %v32_v4 = vadd.s32 8, %v626_v1  ;;  %v33_v5 = vadd.s32 16, %v626_v1  ;;  %p563_p8 = scmp.ne.s32.totalorder %s441_s2, %s562_s27  ;;  %p568_p10 = scmp.lt.s32.totalorder %s562_s27, %s562_s27 }
  0x17   :  { %v34_v6 = vadd.s32 24, %v626_v1  ;;  %v416_v37 = vunpack.c.0.s8 %v415_v33 }
  0x18   :  { %v42_v10 = vrot.slane %v27_v7, %v41_v2  ;;  %v74_v11 = vrot.slane %v28_v8, %v41_v2  ;;  %v38_v12 = vrot.slane %v27_v7, %v37_v3  ;;  %v70_v13 = vrot.slane %v28_v8, %v37_v3  ;;  %p569_p11 = por %p568_p10, %p567_p9 }
  0x19   :  { %v639_v14 = vrot.slane %v29_v9, %v41_v2  ;;  %v103_v22 = vrot.slane %v29_v9, %v37_v3  ;;  %v419_v43 = vsub.s32 %v416_v37, %v626_v1 }
  0x1a   :  { %vm44_vm0 = vcmp.eq.s32.totalorder %v626_v1, %v42_v10  ;;  %vm46_vm1 = vcmp.eq.s32.totalorder %v32_v4, %v42_v10  ;;  %vm76_vm2 = vcmp.eq.s32.totalorder %v626_v1, %v74_v11  ;;  %vm78_vm3 = vcmp.eq.s32.totalorder %v32_v4, %v74_v11  ;;  %p570_p12 = pnand %p569_p11, %p563_p8 }
  0x1b   :  { %vm643_vm4 = vmpackc.low %vm46_vm1, %vm44_vm0  ;;  %vm43_vm5 = vcmp.eq.s32.totalorder %v626_v1, %v38_v12  ;;  %vm45_vm6 = vcmp.eq.s32.totalorder %v32_v4, %v38_v12  ;;  %vm75_vm7 = vcmp.eq.s32.totalorder %v626_v1, %v70_v13  ;;  %vm77_vm8 = vcmp.eq.s32.totalorder %v32_v4, %v70_v13  ;;  %174 = vmatprep.mubr.f32.mxu0 %v639_v14 }
  0x1c   :  { %500 = vmatprep.subr.msk.bf16.mxu0 %vm643_vm4, %v589_v16  ;;  %vm652_vm9 = vmpackc.low %vm78_vm3, %vm76_vm2  ;;  %vm48_vm10 = vcmp.eq.s32.totalorder %v33_v5, %v42_v10  ;;  %vm50_vm11 = vcmp.eq.s32.totalorder %v34_v6, %v42_v10  ;;  %vm80_vm13 = vcmp.eq.s32.totalorder %v33_v5, %v74_v11  ;;  %vm82_vm14 = vcmp.eq.s32.totalorder %v34_v6, %v74_v11 }
  0x1d   :  { %508 = vmatprep.subr.msk.bf16.mxu1 %vm652_vm9, %v589_v16  ;;  %vm658_vm12 = vmpackc.low %vm45_vm6, %vm43_vm5  ;;  %244 = vmatprep.mubr.f32.mxu1 %v639_v14  ;;  %vm47_vm2 = vcmp.eq.s32.totalorder %v33_v5, %v38_v12  ;;  %vm49_vm3 = vcmp.eq.s32.totalorder %v34_v6, %v38_v12  ;;  %vm79_vm5 = vcmp.eq.s32.totalorder %v33_v5, %v70_v13 }
  0x1e   :  { %502 = vmatpush1.bf16.xpose.msk.msra.mxu0 %vm658_vm12, %v589_v16  ;;  %vm664_vm15 = vmpackc.low %vm77_vm8, %vm75_vm7  ;;  %vm81_vm6 = vcmp.eq.s32.totalorder %v34_v6, %v70_v13 }
  0x1f   :  { %510 = vmatpush1.bf16.xpose.msk.msra.mxu1 %vm664_vm15, %v589_v16  ;;  %vm671_vm0 = vmpackc.low %vm50_vm11, %vm48_vm10  ;;  %vm431_vm11 = vcmp.lt.s32.totalorder %v30_v0, 256 }
  0x20   :  { %504 = vmatprep.subr.msk.bf16.mxu0 %vm671_vm0, %v589_v16  ;;  %vm677_vm1 = vmpackc.low %vm82_vm14, %vm80_vm13 }
  0x21   :  { %512 = vmatprep.subr.msk.bf16.mxu1 %vm677_vm1, %v589_v16  ;;  %vm505_vm7 = vmpackc.low %vm49_vm3, %vm47_vm2 }
  0x22   :  { %vm513_vm8 = vmpackc.low %vm81_vm6, %vm79_vm5 }
  0x26   :  { %506 = vmatpush1.bf16.xpose.msk.msra.mxu0 %vm505_vm7, %v589_v16 }
  0x27   :  { %514 = vmatpush1.bf16.xpose.msk.msra.mxu1 %vm513_vm8, %v589_v16  ;;  %516 = vmatprep.subr.msk.bf16.mxu0 %vm643_vm4, %v589_v16  ;;  %vm258_vm4 = vcmask 261120  }
  0x28   :  { %524 = vmatprep.subr.msk.bf16.mxu1 %vm652_vm9, %v589_v16 }
  0x2d   :  { %175 = vmatmul.mubr.f32.vlgmr.msra.gmra.mrb[0].mxu0 %v103_v22 }
  0x2e   :  { %245 = vmatmul.mubr.f32.vlgmr.msra.gmra.mrb[0].mxu1 %v103_v22  ;;  %518 = vmatpush1.bf16.msk.msra.mxu0 %vm658_vm12, %v589_v16 }
  0x2f   :  { %526 = vmatpush1.bf16.msk.msra.mxu1 %vm664_vm15, %v589_v16  ;;  %520 = vmatprep.subr.msk.bf16.mxu0 %vm671_vm0, %v589_v16 }
  0x30   :  { %528 = vmatprep.subr.msk.bf16.mxu1 %vm677_vm1, %v589_v16  ;;  %326 = vmatprep.mubr.f32.mxu0 %v590_v23 }
  0x31   :  { %400 = vmatprep.mubr.f32.mxu1 %v590_v23 }
  0x32   :  { %522 = vmatpush1.bf16.msk.msra.mxu0 %vm505_vm7, %v589_v16 }
  0x33   :  { %530 = vmatpush1.bf16.msk.msra.mxu1 %vm513_vm8, %v589_v16 }
 0x100   :  { %v176_v24 = vpop.f32.mrb[0].mxu0 }
 0x101   :  { %536 = vrsqrt.f32 %v176_v24  ;;  %v246_v25 = vpop.f32.mrb[0].mxu1  ;;  %v178_v26 = vpop.f32.mrb[1].mxu0  ;;  %vm250_vm9 = vcmp.gt.f32.partialorder %v176_v24, 0.0 }
 0x102   :  { %538 = vrsqrt.f32 %v246_v25  ;;  %v248_v27 = vpop.f32.mrb[1].mxu1  ;;  %vm254_vm10 = vcmp.gt.f32.partialorder %v246_v25, 0.0 }
 0x10b   :  { %v537_v28 = vpop.eup %536 }
 0x10c   :  { %v539_v29 = vpop.eup %538  ;;  %v253_v30 = vsel %vm250_vm9, %v537_v28, 0.0 }
 0x10d   :  { %v257_v31 = vsel %vm254_vm10, %v539_v29, 0.0  ;;  %489 = vmatmul.mubr.msk.f32.vlgmr.msra.gmra.mrb[2].mxu0 %vm258_vm4, %v253_v30 }
 0x10e   :  { %498 = vmatmul.mubr.msk.f32.vlgmr.msra.gmra.mrb[2].mxu1 %vm258_vm4, %v257_v31 }
 0x1e0   :  { %v328_v34 = vpop.f32.mrb[2].mxu0 }
 0x1e1   :  { %v402_v35 = vpop.f32.mrb[2].mxu1  ;;  %v330_v36 = vpop.f32.mrb[3].mxu0 }
 0x1e2   :  { %v407_v38 = vmul.f32 %v402_v35, %v328_v34  ;;  %v404_v39 = vpop.f32.mrb[3].mxu1 }
 0x1e3   :  { %v408_v40 = vmul.f32 %v404_v39, %v330_v36 }
 0x1e4   :  { %v409_v41 = vmul.f32 %v407_v38, %v103_v22 }
 0x1e5   :  { %v410_v42 = vmul.f32 %v408_v40, %v639_v14 }
 0x1e7   :  { %v413_v44 = vcombine.low %v409_v41, %v410_v42 }
 0x1e9   :  { %v420_v45 = vrot.slane %v413_v44, %v419_v43 }
 0x1eb   :  { %v427_v46 = vrot.slane %v420_v45, %v419_v43 }
 0x1ed   :  { %433 = vst.msk [vmem:[#allocation5] sm:$0x3] %vm431_vm11, %v427_v46 }
 0x1ee   :  { %573 = shalt.err (!%p570_p12)
}
 0x1ef   :  { %s574_s30 = scalar_lea.hbm %s713_s3, 32 }
 0x1f0   :  { %p575_p13 = scmp.ne.s32.totalorder %s713_s3, %s574_s30  ;;  %p578_p0 = scmp.lt.u32.totalorder %s574_s30, %s713_s3 }
 0x1f2   :  { %p580_p1 = pnand %p578_p0, %p575_p13 }
 0x1f4   :  { %583 = shalt.err (!%p580_p1)
}
 0x1f5   :  { %443 = dma.vmem_to_hbm [thread:$0]  %s441_s2, 32, %s713_s3, [#allocation4]  }
 0x1f6   :  { %586 = dma.done.wait [#allocation4], 32  }
 0x1f7   :  { %587 = vsyncadd [#allocation4], 4294967264 }
 0x1f8   :  { %447 = vsyncpa [#allocation3], 1 }
 0x1f9   :  { %448 = vsyncpa [#allocation4], 1 }

</bundles_post_ra>
